<compile_context>
chip_gen: v7x
topology: tpu7x:2x2x1
jax: 0.10.0
libtpu: 0.0.40
codegen_flags: <defaults>
</compile_context>

<pallas_src>
import functools

import numpy as np

import jax
import jax.numpy as jnp
from jax.experimental import pallas as pl
from jax.experimental.pallas import tpu as pltpu


# ----------------------------- batch mixing ---------------------------------


def _mix_batch_kernel(lam_ref, x_ref, prev_ref, o_ref, *, tb):
    # lam_ref  : (1,) float32 in SMEM
    # x_ref    : (tb, C, H*W) block of batch rows [i*tb, (i+1)*tb)
    # prev_ref : (1, C, H*W)  batch row (i*tb - 1) mod B  (rolled source of row 0)
    # o_ref    : (tb, C, H*W) mixed output block
    lam = lam_ref[0]                                # f32 scalar
    x = x_ref[...].astype(jnp.float32)
    prev = prev_ref[...].astype(jnp.float32)
    if tb == 1:
        rolled = prev
    else:
        # roll(batch, 1, axis=0) restricted to this block: [prev, x[0], ..., x[tb-2]]
        rolled = jnp.concatenate([prev, x[: tb - 1]], axis=0)
    # lam*x + (1-lam)*rolled  ==  rolled + lam*(x - rolled)   (1 sub + 1 FMA, in f32)
    o_ref[...] = (rolled + lam * (x - rolled)).astype(o_ref.dtype)


def _padded_row_bytes(c, hw, itemsize):
    # VMEM footprint of one (C, H*W) image slab after (8, 128) tile padding.
    sub = -(-c // 8) * 8
    lane = -(-hw // 128) * 128
    return sub * lane * itemsize


def _choose_tb(batch_size, padded_row_bytes, target_block_bytes=2 << 20):
    # Largest TB <= batch_size with TB * row_bytes <= ~2 MB that divides the
    # batch evenly (so every block is full and the roll bookkeeping is exact).
    max_tb = max(1, min(batch_size, target_block_bytes // max(padded_row_bytes, 1)))
    if max_tb >= batch_size:
        return batch_size
    for tb in range(max_tb, 0, -1):
        if batch_size % tb == 0:
            return tb
    return 1


def mixup_batch(x, lam_arr):
    B, C, H, W = x.shape
    HW = H * W
    x3 = x.reshape(B, C, HW)
    itemsize = x.dtype.itemsize
    tb = _choose_tb(B, _padded_row_bytes(C, HW, itemsize))

    out = pl.pallas_call(
        functools.partial(_mix_batch_kernel, tb=tb),
        out_shape=jax.ShapeDtypeStruct((B, C, HW), x.dtype),
        grid=(B // tb,),
        in_specs=[
            pl.BlockSpec(memory_space=pltpu.MemorySpace.SMEM),               # lam (f32 scalar)
            pl.BlockSpec((tb, C, HW), lambda i: (i, 0, 0)),                  # batch block i
            # single extra row per block: the element preceding the block
            # (wraps to B-1 for block 0); `+ B - 1` keeps the mod non-negative.
            pl.BlockSpec((1, C, HW), lambda i: ((i * tb + B - 1) % B, 0, 0)),
        ],
        out_specs=pl.BlockSpec((tb, C, HW), lambda i: (i, 0, 0)),
        compiler_params=pltpu.CompilerParams(
            dimension_semantics=("parallel",),       # blocks independent -> megacore on v7x
            vmem_limit_bytes=32 * 1024 * 1024,       # safe on v5e (16 MiB default) and v7x (64 MiB phys)
        ),
    )(lam_arr, x3, x3)
    return out.reshape(B, C, H, W)


# ----------------------------- target mixing ---------------------------------
# Tiny (B, num_classes) problem; kept as a simple single-shot Pallas kernel.


def _mix_target_kernel(lam_ref, t_ref, tr_ref, o_ref):
    # t_ref / tr_ref : (B, 1) int32 class ids (original / rolled)
    # o_ref          : (B, num_classes) mixed one-hot targets
    lam = lam_ref[0]                                 # f32 scalar
    b, nc = o_ref.shape
    classes = jax.lax.broadcasted_iota(jnp.int32, (b, nc), 1)
    oh = (t_ref[...] == classes).astype(jnp.float32)
    ohr = (tr_ref[...] == classes).astype(jnp.float32)
    o_ref[...] = (ohr + lam * (oh - ohr)).astype(o_ref.dtype)


def mixup_target(target, num_classes, lam_arr, dtype):
    B = target.shape[0]
    t = target.astype(jnp.int32).reshape(B, 1)
    tr = jnp.roll(t, 1, axis=0)  # glue: tiny (B,) index roll; one-hot + mix done in-kernel
    return pl.pallas_call(
        _mix_target_kernel,
        out_shape=jax.ShapeDtypeStruct((B, num_classes), dtype),
        in_specs=[
            pl.BlockSpec(memory_space=pltpu.MemorySpace.SMEM),
            pl.BlockSpec(memory_space=pltpu.MemorySpace.VMEM),
            pl.BlockSpec(memory_space=pltpu.MemorySpace.VMEM),
        ],
        out_specs=pl.BlockSpec(memory_space=pltpu.MemorySpace.VMEM),
    )(lam_arr, t, tr)


# ------------------------------- module --------------------------------------


class RandomMixup:
    """Pallas-TPU port of birder's RandomMixup (no learnable parameters)."""

    def __init__(self, num_classes: int, p: float, alpha: float) -> None:
        if num_classes < 1:
            raise ValueError(
                f"Please provide a valid positive value for the num_classes. Got num_classes={num_classes}"
            )
        if alpha <= 0:
            raise ValueError("Alpha param must be positive")
        self.num_classes = num_classes
        self.p = p
        self.alpha = alpha

    def __call__(self, batch, target, *, rng=None):
        if batch.ndim != 4:
            raise ValueError(f"Batch ndim should be 4. Got {batch.ndim}")
        if target.ndim != 1:
            raise ValueError(f"Target ndim should be 1. Got {target.ndim}")
        # TODO(synk): PyTorch requires int64 targets; TPU/JAX default is int32 —
        # class-id semantics are identical.

        # Host-side randomness (mirrors torch.rand(1).item() / _sample_dirichlet);
        # avoids a device->host round trip before any kernel launches.
        if rng is None:
            rng = np.random.default_rng()
        apply_mix = float(rng.random()) < self.p
        lam = float(rng.beta(self.alpha, self.alpha)) if apply_mix else 1.0

        # lam stays float32 (SMEM scalars are 32-bit; never rounded to bf16).
        lam_arr = jnp.asarray([lam], dtype=jnp.float32)

        mixed_target = mixup_target(target, self.num_classes, lam_arr, batch.dtype)
        if not apply_mix:
            # Fast path: skip the batch kernel entirely (no HBM pass for an identity).
            return batch, mixed_target, lam

        mixed_batch = mixup_batch(batch, lam_arr)
        return mixed_batch, mixed_target, lam  # lam returned for verification only

    def __repr__(self) -> str:
        return f"{self.__class__.__name__}(num_classes={self.num_classes}, p={self.p}, alpha={self.alpha})"


# ------------------------------ verification ----------------------------------


def _reference(batch, target, num_classes, lam):
    oh = jax.nn.one_hot(target, num_classes, dtype=batch.dtype)
    b = lam * batch + (1.0 - lam) * jnp.roll(batch, 1, axis=0)
    t = lam * oh + (1.0 - lam) * jnp.roll(oh, 1, axis=0)
    return b, t


if __name__ == "__main__":
    B, C, H, W = 2, 4, 16, 16
    NUM_CLASSES = 10

    key = jax.random.PRNGKey(0)
    kx, kt = jax.random.split(key)
    batch = jax.random.normal(kx, (B, C, H, W), dtype=jnp.float32)
    target = jax.random.randint(kt, (B,), 0, NUM_CLASSES, dtype=jnp.int32)

    # Mix path (p=1.0 -> always applies mixup).
    mixup = RandomMixup(num_classes=NUM_CLASSES, p=1.0, alpha=0.2)
    out_batch, out_target, lam = mixup(batch, target, rng=np.random.default_rng(0))
    out_batch = jax.block_until_ready(out_batch)
    out_target = jax.block_until_ready(out_target)

    ref_batch, ref_target = _reference(batch, target, NUM_CLASSES, lam)
    assert out_batch.shape == (B, C, H, W) and out_batch.dtype == jnp.float32
    assert out_target.shape == (B, NUM_CLASSES) and out_target.dtype == jnp.float32
    assert jnp.allclose(out_batch, ref_batch, atol=1e-6)
    assert jnp.allclose(out_target, ref_target, atol=1e-6)

    # No-mix fast path (p=0.0 -> batch unchanged, plain one-hot target).
    mixup_off = RandomMixup(num_classes=NUM_CLASSES, p=0.0, alpha=0.2)
    id_batch, id_target, _ = mixup_off(batch, target, rng=np.random.default_rng(1))
    id_batch = jax.block_until_ready(id_batch)
    id_target = jax.block_until_ready(id_target)
    assert jnp.allclose(id_batch, batch)
    assert jnp.allclose(id_target, jax.nn.one_hot(target, NUM_CLASSES, dtype=jnp.float32))

    print("KERNEL_OK")
</pallas_src>

<mosaic_0001>
module attributes {stable_mosaic.version = 11 : i64} {
  func.func @_mix_target_kernel(%arg0: memref<1xf32, #tpu.memory_space<smem>>, %arg1: memref<2x1xi32, #tpu.memory_space<vmem>>, %arg2: memref<2x1xi32, #tpu.memory_space<vmem>>, %arg3: memref<2x10xf32, #tpu.memory_space<vmem>>) attributes {dimension_semantics = [], scalar_prefetch = 0 : i64, scratch_operands = 0 : i64, tpu.core_type = #tpu.core_type<tc>} {
    %c0 = arith.constant 0 : index
    %0 = memref.load %arg0[%c0] : memref<1xf32, #tpu.memory_space<smem>>
    %1 = tpu.iota {dimensions = array<i32: 1>} : vector<2x10xi32>
    %c0_0 = arith.constant 0 : index
    %c0_1 = arith.constant 0 : index
    %2 = vector.load %arg1[%c0_0, %c0_1] : memref<2x1xi32, #tpu.memory_space<vmem>>, vector<2x1xi32>
    %3 = vector.broadcast %2 : vector<2x1xi32> to vector<2x10xi32>
    %4 = arith.cmpi eq, %3, %1 : vector<2x10xi32>
    %5 = arith.extui %4 : vector<2x10xi1> to vector<2x10xi32>
    %6 = arith.sitofp %5 : vector<2x10xi32> to vector<2x10xf32>
    %c0_2 = arith.constant 0 : index
    %c0_3 = arith.constant 0 : index
    %7 = vector.load %arg2[%c0_2, %c0_3] : memref<2x1xi32, #tpu.memory_space<vmem>>, vector<2x1xi32>
    %8 = vector.broadcast %7 : vector<2x1xi32> to vector<2x10xi32>
    %9 = arith.cmpi eq, %8, %1 : vector<2x10xi32>
    %10 = arith.extui %9 : vector<2x10xi1> to vector<2x10xi32>
    %11 = arith.sitofp %10 : vector<2x10xi32> to vector<2x10xf32>
    %12 = arith.subf %6, %11 : vector<2x10xf32>
    %13 = vector.broadcast %0 : f32 to vector<2x10xf32>
    %14 = arith.mulf %13, %12 : vector<2x10xf32>
    %15 = arith.addf %11, %14 : vector<2x10xf32>
    %c0_4 = arith.constant 0 : index
    %c0_5 = arith.constant 0 : index
    %16 = vector.load %arg3[%c0_4, %c0_5] : memref<2x10xf32, #tpu.memory_space<vmem>>, vector<2x10xf32>
    tpu.vector_store %arg3[%c0_4, %c0_5], %15 {strides = array<i32>} : memref<2x10xf32, #tpu.memory_space<vmem>>, vector<2x10xf32>,
    return
  }
}

</mosaic_0001>

<bundles_post_ra>
// kernel: tpu_custom_call.1
= control target key start
LH: loop header
LB: loop body
LE: loop exit
PB: predicated region body
PF: predicated region fallthrough
CT: control target
= control target key end

     0   :  { %v83_v1 = vmov 0   ;;  %s127_s0 = inlined_call_operand.<no memory space> [shape: f32[1], index: 0, kind: input, shape index: {}]   ;;  %s128_s1 = inlined_call_operand.vmem [shape: s32[2,1], index: 1, kind: input, shape index: {}]   ;;  %s129_s2 = inlined_call_operand.vmem [shape: s32[2,1], index: 2, kind: input, shape index: {}]   ;;  %s130_s3 = inlined_call_operand.hbm [shape: f32[2,10], index: 3, kind: output, shape index: {}]  }
   0x1   :  { %v19_v0 = vld [vmem:[%s128_s1] sm:$0x3]  ;;  %58 = vset.pattern.permute.xlu0 %v83_v1 }
   0x2   :  { %9 = vsyncpa [#allocation4], 0  ;;  %21 = vperm.xlu0 %58, %v19_v0   ;;  %v26_v2 = vld [vmem:[%s129_s2] sm:$0x3]  ;;  %v17_v3 = vlaneseq  ;;  %v84_v7 = vmov 0.0   ;;  %v34_v9 = vstv %s127_s0  ;;  %s85_s1 = smov [#allocation3]  }
   0x3   :  { %s45_s18 = sshll.u32 %s85_s1, 4  ;;  %vm37_vm2 = vcmask 74752   ;;  %s46_s18 = int_to_ptr.vmem [resolvable:$true] %s45_s18 }
   0x4   :  { %v18_v4 = vand.u32 127, %v17_v3  ;;  %s59_s2 = scalar_lea.vmem %s46_s18, 32  ;;  %p64_p1 = scmp.lt.s32.totalorder %s46_s18, %s46_s18 }
   0x5   :  { %p60_p0 = scmp.ne.s32.totalorder %s46_s18, %s59_s2  ;;  %p65_p2 = scmp.lt.s32.totalorder %s59_s2, %s59_s2 }
   0x6   :  { %28 = vperm.xlu0 %58, %v26_v2  }
   0x7   :  { %p66_p3 = por %p65_p2, %p64_p1 }
   0x9   :  { %p67_p4 = pnand %p66_p3, %p60_p0 }
  0x81   :  { %v22_v5 = vpop.permute.xlu0 %21 }
  0x82   :  { %vm23_vm0 = vcmp.eq.s32.totalorder %v22_v5, %v18_v4 }
  0x83   :  { %v53_v8 = vsel %vm23_vm0, 1.0, %v84_v7 }
  0x85   :  { %v29_v6 = vpop.permute.xlu0 %28 }
  0x86   :  { %vm30_vm1 = vcmp.eq.s32.totalorder %v29_v6, %v18_v4 }
  0x87   :  { %v54_v10 = vsel %vm30_vm1, 1.0, %v84_v7 }
  0x88   :  { %v33_v11 = vsub.f32 %v53_v8, %v54_v10 }
  0x8a   :  { %v35_v12 = vmul.f32 %v34_v9, %v33_v11 }
  0x8c   :  { %v36_v13 = vadd.f32 %v54_v10, %v35_v12 }
  0x8e   :  { %38 = vst.msk [vmem:[#allocation3] sm:$0x3] %vm37_vm2, %v36_v13 }
  0x8f   :  { %70 = shalt.err (!%p67_p4)
}
  0x90   :  { %s71_s0 = scalar_lea.hbm %s130_s3, 32 }
  0x91   :  { %p72_p5 = scmp.ne.s32.totalorder %s130_s3, %s71_s0  ;;  %p75_p6 = scmp.lt.u32.totalorder %s71_s0, %s130_s3 }
  0x93   :  { %p77_p7 = pnand %p75_p6, %p72_p5 }
  0x95   :  { %80 = shalt.err (!%p77_p7)
}
  0x96   :  { %48 = dma.vmem_to_hbm [thread:$0]  %s46_s18, 32, %s130_s3, [#allocation4]  }
  0x97   :  { %81 = dma.done.wait [#allocation4], 32  }
  0x98   :  { %82 = vsyncadd [#allocation4], 4294967264 }
  0x99   :  { %52 = vsyncpa [#allocation4], 1 }

</bundles_post_ra>
